<compile_context>
chip_gen: v5e
topology: v5e:2x2
jax: 0.10.0
libtpu: 0.0.40
codegen_flags: <defaults>
</compile_context>

<pallas_src>
import functools

import jax
import jax.numpy as jnp
from jax.experimental import pallas as pl
from jax.experimental.pallas import tpu as pltpu

LANE = 128      # vreg lane width — feature dims padded to multiples of this
SUBLANE = 8     # vreg sublane width — batch padded to multiples of this


def _round_up(x, m):
    return ((x + m - 1) // m) * m


def qnet_kernel(x_ref, w1_ref, b1_ref, w2_ref, b2_ref, o_ref):
    # Layer 1: (B_TILE, IN_P)bf16 @ (IN_P, H_P)bf16 -> f32 accumulate on MXU.
    x = x_ref[...]
    h = jnp.dot(x, w1_ref[...], preferred_element_type=jnp.float32)
    # Epilogue in f32 on the VPU (bias broadcast + ReLU).
    h = jnp.maximum(h + b1_ref[...], 0.0)
    # Layer 2: contraction already padded to H_P (zero rows in W2), no relayout needed.
    out = jnp.dot(h.astype(w2_ref.dtype), w2_ref[...], preferred_element_type=jnp.float32)
    o_ref[...] = (out + b2_ref[...]).astype(o_ref.dtype)


@functools.partial(jax.jit, static_argnames=("input_size", "hidden_size", "output_size"))
def linear_qnet_forward(x, w1, b1, w2, b2, *, input_size, hidden_size, output_size):
    """x: (B, in) f32; w1: (in, hidden); b1: (hidden,) or (1, hidden); w2: (hidden, out); b2: (out,) or (1, out)."""
    B = x.shape[0]

    # Lane-dense padded sizes.
    IN_P = _round_up(input_size, LANE)
    H_P = _round_up(hidden_size, LANE)
    OUT_P = _round_up(output_size, LANE)

    # Batch tiling: up to 128 rows per grid step, batch padded to a tile multiple.
    B_TILE = min(128, _round_up(B, SUBLANE))
    B_pad = _round_up(B, B_TILE)
    grid = (B_pad // B_TILE,)

    # Zero-pad operands (zeros in the padded region keep the math exact).
    x_p = jnp.zeros((B_pad, IN_P), jnp.float32).at[:B, :input_size].set(x)
    w1_p = jnp.zeros((IN_P, H_P), jnp.float32).at[:input_size, :hidden_size].set(w1)
    b1_p = jnp.zeros((1, H_P), jnp.float32).at[:, :hidden_size].set(b1.reshape(1, hidden_size))
    w2_p = jnp.zeros((H_P, OUT_P), jnp.float32).at[:hidden_size, :output_size].set(w2)
    b2_p = jnp.zeros((1, OUT_P), jnp.float32).at[:, :output_size].set(b2.reshape(1, output_size))

    # bf16 operands for the MXU; biases stay f32 for the VPU epilogue.
    x_b = x_p.astype(jnp.bfloat16)
    w1_b = w1_p.astype(jnp.bfloat16)
    w2_b = w2_p.astype(jnp.bfloat16)

    flops = 2 * B_pad * (IN_P * H_P + H_P * OUT_P)
    bytes_accessed = (x_b.size * 2 + w1_b.size * 2 + w2_b.size * 2
                      + b1_p.size * 4 + b2_p.size * 4 + B_pad * OUT_P * 4)

    out_p = pl.pallas_call(
        qnet_kernel,
        out_shape=jax.ShapeDtypeStruct((B_pad, OUT_P), jnp.float32),
        grid=grid,
        in_specs=[
            pl.BlockSpec((B_TILE, IN_P), lambda i: (i, 0)),   # x tile marches over batch
            pl.BlockSpec((IN_P, H_P), lambda i: (0, 0)),      # weights: constant index_map
            pl.BlockSpec((1, H_P), lambda i: (0, 0)),         #   -> resident in VMEM across steps
            pl.BlockSpec((H_P, OUT_P), lambda i: (0, 0)),
            pl.BlockSpec((1, OUT_P), lambda i: (0, 0)),
        ],
        out_specs=pl.BlockSpec((B_TILE, OUT_P), lambda i: (i, 0)),
        compiler_params=pltpu.CompilerParams(
            dimension_semantics=("parallel",),                # v7x: split batch over 2 TCs
            vmem_limit_bytes=32 * 1024 * 1024,
        ),
        cost_estimate=pl.CostEstimate(
            flops=flops, transcendentals=0, bytes_accessed=bytes_accessed),
    )(x_b, w1_b, b1_p, w2_b, b2_p)

    # Wrapper slices the real rows/columns back out of the lane-dense slab.
    return out_p[:B, :output_size]


def init_params(key, input_size, hidden_size, output_size):
    """Deterministic init mirroring torch.nn.Linear's U(-1/sqrt(fan_in), 1/sqrt(fan_in))."""
    k1, k2, k3, k4 = jax.random.split(key, 4)
    bound1 = 1.0 / jnp.sqrt(input_size)
    bound2 = 1.0 / jnp.sqrt(hidden_size)
    # Stored pre-transposed: (in_features, out_features)
    w1 = jax.random.uniform(k1, (input_size, hidden_size), jnp.float32, -bound1, bound1)
    b1 = jax.random.uniform(k2, (hidden_size,), jnp.float32, -bound1, bound1)
    w2 = jax.random.uniform(k3, (hidden_size, output_size), jnp.float32, -bound2, bound2)
    b2 = jax.random.uniform(k4, (output_size,), jnp.float32, -bound2, bound2)
    return w1, b1, w2, b2


if __name__ == "__main__":
    # Small shapes consistent with the module (Q-net: 16 features -> 32 hidden -> 4 actions)
    batch, input_size, hidden_size, output_size = 8, 16, 32, 4

    key = jax.random.PRNGKey(0)
    kx, kp = jax.random.split(key)
    x = jax.random.normal(kx, (batch, input_size), jnp.float32)
    w1, b1, w2, b2 = init_params(kp, input_size, hidden_size, output_size)

    out = linear_qnet_forward(x, w1, b1, w2, b2,
                              input_size=input_size,
                              hidden_size=hidden_size,
                              output_size=output_size)
    out = jax.block_until_ready(out)
    assert out.shape == (batch, output_size)

    # Reference mirroring the kernel's precision (bf16 operands, f32 accumulation).
    xb, w1b, w2b = (a.astype(jnp.bfloat16) for a in (x, w1, w2))
    h_ref = jnp.maximum(jnp.dot(xb, w1b, preferred_element_type=jnp.float32) + b1, 0.0)
    ref_bf16 = jnp.dot(h_ref.astype(jnp.bfloat16), w2b,
                       preferred_element_type=jnp.float32) + b2
    assert jnp.allclose(out, ref_bf16, atol=1e-4, rtol=1e-4)

    # Loose sanity check against the full-f32 reference (bf16 operand rounding only).
    ref_f32 = jnp.maximum(x @ w1 + b1, 0.0) @ w2 + b2
    assert jnp.allclose(out, ref_f32, atol=5e-2, rtol=5e-2)

    print("KERNEL_OK")
</pallas_src>

<mosaic_0001>
module attributes {stable_mosaic.version = 11 : i64} {
  func.func @qnet_kernel(%arg0: i32, %arg1: memref<8x128xbf16, #tpu.memory_space<vmem>>, %arg2: memref<128x128xbf16, #tpu.memory_space<vmem>>, %arg3: memref<1x128xf32, #tpu.memory_space<vmem>>, %arg4: memref<128x128xbf16, #tpu.memory_space<vmem>>, %arg5: memref<1x128xf32, #tpu.memory_space<vmem>>, %arg6: memref<8x128xf32, #tpu.memory_space<vmem>>) attributes {dimension_semantics = [#tpu.dimension_semantics<parallel>], iteration_bounds = array<i64: 1>, scalar_prefetch = 0 : i64, scratch_operands = 0 : i64, tpu.core_type = #tpu.core_type<tc>, window_params = [{transform_indices = @transform_0, window_bounds = array<i64: 8, 128>}, {pipeline_mode = #tpu.pipeline_mode<synchronous>, transform_indices = @transform_1, window_bounds = array<i64: 128, 128>}, {pipeline_mode = #tpu.pipeline_mode<synchronous>, transform_indices = @transform_2, window_bounds = array<i64: 1, 128>}, {pipeline_mode = #tpu.pipeline_mode<synchronous>, transform_indices = @transform_3, window_bounds = array<i64: 128, 128>}, {pipeline_mode = #tpu.pipeline_mode<synchronous>, transform_indices = @transform_4, window_bounds = array<i64: 1, 128>}, {transform_indices = @transform_5, window_bounds = array<i64: 8, 128>}]} {
    %c0 = arith.constant 0 : index
    %c0_0 = arith.constant 0 : index
    %0 = vector.load %arg1[%c0, %c0_0] : memref<8x128xbf16, #tpu.memory_space<vmem>>, vector<8x128xbf16>
    %c0_1 = arith.constant 0 : index
    %c0_2 = arith.constant 0 : index
    %1 = vector.load %arg2[%c0_1, %c0_2] : memref<128x128xbf16, #tpu.memory_space<vmem>>, vector<128x128xbf16>
    %cst = arith.constant dense<0.000000e+00> : vector<8x128xf32>
    %2 = tpu.matmul %0, %1, %cst {dimension_numbers = #tpu.dot_dimension_numbers<[1], [0], [0], [1], [0, 0, 1, 1], [], []>} : vector<8x128xbf16>, vector<128x128xbf16>, vector<8x128xf32> -> vector<8x128xf32>
    %c0_3 = arith.constant 0 : index
    %c0_4 = arith.constant 0 : index
    %3 = vector.load %arg3[%c0_3, %c0_4] : memref<1x128xf32, #tpu.memory_space<vmem>>, vector<1x128xf32>
    %4 = vector.broadcast %3 : vector<1x128xf32> to vector<8x128xf32>
    %5 = arith.addf %2, %4 : vector<8x128xf32>
    %cst_5 = arith.constant 0.000000e+00 : f32
    %6 = vector.broadcast %cst_5 : f32 to vector<8x128xf32>
    %7 = arith.maximumf %5, %6 : vector<8x128xf32>
    %8 = arith.truncf %7 : vector<8x128xf32> to vector<8x128xbf16>
    %c0_6 = arith.constant 0 : index
    %c0_7 = arith.constant 0 : index
    %9 = vector.load %arg4[%c0_6, %c0_7] : memref<128x128xbf16, #tpu.memory_space<vmem>>, vector<128x128xbf16>
    %cst_8 = arith.constant dense<0.000000e+00> : vector<8x128xf32>
    %10 = tpu.matmul %8, %9, %cst_8 {dimension_numbers = #tpu.dot_dimension_numbers<[1], [0], [0], [1], [0, 0, 1, 1], [], []>} : vector<8x128xbf16>, vector<128x128xbf16>, vector<8x128xf32> -> vector<8x128xf32>
    %c0_9 = arith.constant 0 : index
    %c0_10 = arith.constant 0 : index
    %11 = vector.load %arg5[%c0_9, %c0_10] : memref<1x128xf32, #tpu.memory_space<vmem>>, vector<1x128xf32>
    %12 = vector.broadcast %11 : vector<1x128xf32> to vector<8x128xf32>
    %13 = arith.addf %10, %12 : vector<8x128xf32>
    %c0_11 = arith.constant 0 : index
    %c0_12 = arith.constant 0 : index
    %14 = vector.load %arg6[%c0_11, %c0_12] : memref<8x128xf32, #tpu.memory_space<vmem>>, vector<8x128xf32>
    tpu.vector_store %arg6[%c0_11, %c0_12], %13 {strides = array<i32>} : memref<8x128xf32, #tpu.memory_space<vmem>>, vector<8x128xf32>,
    return
  }
  func.func @transform_0(%arg0: i32) -> (i32, i32) {
    %c0_i32 = arith.constant 0 : i32
    %c0_i32_0 = arith.constant 0 : i32
    return %arg0, %c0_i32 : i32, i32
  }
  func.func @transform_1(%arg0: i32) -> (i32, i32) {
    %c0_i32 = arith.constant 0 : i32
    %c0_i32_0 = arith.constant 0 : i32
    %c0_i32_1 = arith.constant 0 : i32
    return %c0_i32, %c0_i32_0 : i32, i32
  }
  func.func @transform_2(%arg0: i32) -> (i32, i32) {
    %c0_i32 = arith.constant 0 : i32
    %c0_i32_0 = arith.constant 0 : i32
    %c0_i32_1 = arith.constant 0 : i32
    return %c0_i32, %c0_i32_0 : i32, i32
  }
  func.func @transform_3(%arg0: i32) -> (i32, i32) {
    %c0_i32 = arith.constant 0 : i32
    %c0_i32_0 = arith.constant 0 : i32
    %c0_i32_1 = arith.constant 0 : i32
    return %c0_i32, %c0_i32_0 : i32, i32
  }
  func.func @transform_4(%arg0: i32) -> (i32, i32) {
    %c0_i32 = arith.constant 0 : i32
    %c0_i32_0 = arith.constant 0 : i32
    %c0_i32_1 = arith.constant 0 : i32
    return %c0_i32, %c0_i32_0 : i32, i32
  }
  func.func @transform_5(%arg0: i32) -> (i32, i32) {
    %c0_i32 = arith.constant 0 : i32
    %c0_i32_0 = arith.constant 0 : i32
    return %arg0, %c0_i32 : i32, i32
  }
}

</mosaic_0001>

<bundles_post_ra>
// kernel: linear_qnet_forward.1
= control target key start
LH: loop header
LB: loop body
LE: loop exit
PB: predicated region body
PF: predicated region fallthrough
CT: control target
= control target key end

     0   :  { %s362_s1 = inlined_call_operand.vmem [shape: bf16[128,128], index: 1, kind: input, shape index: {}]   ;;  %s363_s3 = inlined_call_operand.vmem [shape: bf16[128,128], index: 3, kind: input, shape index: {}]   ;;  %s364_s2 = inlined_call_operand.vmem [shape: f32[1,128], index: 2, kind: input, shape index: {}]   ;;  %s365_s0 = inlined_call_operand.vmem [shape: bf16[8,128], index: 0, kind: input, shape index: {}]   ;;  %s366_s4 = inlined_call_operand.vmem [shape: f32[1,128], index: 4, kind: input, shape index: {}]   ;;  %s367_s5 = inlined_call_operand.vmem [shape: f32[8,128], index: 5, kind: output, shape index: {}]  }
   0x1   :  { %v261_v0 = vld [vmem:[%s362_s1 + $0x38] sm:$0xff]  ;;  %v260_v1 = vld [vmem:[%s362_s1 + $0x30] sm:$0xff]  ;;  %v259_v4 = vld [vmem:[%s362_s1 + $0x28] sm:$0xff] }
   0x2   :  { %89 = vmatpush.bf16.msra.mxu0 %v261_v0  ;;  %v269_v2 = vld [vmem:[%s363_s3 + $0x38] sm:$0xff]  ;;  %v268_v3 = vld [vmem:[%s363_s3 + $0x30] sm:$0xff]  ;;  %v267_v5 = vld [vmem:[%s363_s3 + $0x28] sm:$0xff] }
   0x3   :  { %172 = vmatpush.bf16.msra.mxu1 %v269_v2  ;;  %v258_v6 = vld [vmem:[%s362_s1 + $0x20] sm:$0xff]  ;;  %v257_v8 = vld [vmem:[%s362_s1 + $0x18] sm:$0xff]  ;;  %v256_v10 = vld [vmem:[%s362_s1 + $0x10] sm:$0xff] }
   0x4   :  { %v266_v7 = vld [vmem:[%s363_s3 + $0x20] sm:$0xff]  ;;  %v265_v9 = vld [vmem:[%s363_s3 + $0x18] sm:$0xff]  ;;  %v264_v11 = vld [vmem:[%s363_s3 + $0x10] sm:$0xff] }
   0x5   :  { %v255_v12 = vld [vmem:[%s362_s1 + $0x8] sm:$0xff]  ;;  %v254_v13 = vld [vmem:[%s362_s1] sm:$0xff] }
   0x6   :  { %90 = vmatpush.bf16.msra.mxu0 %v260_v1  ;;  %v20_v14 = vld [vmem:[%s365_s0] sm:$0xf]  ;;  %v263_v15 = vld [vmem:[%s363_s3 + $0x8] sm:$0xff] }
   0x7   :  { %173 = vmatpush.bf16.msra.mxu1 %v268_v3  ;;  %v262_v16 = vld [vmem:[%s363_s3] sm:$0xff] }
   0x8   :  { %v270_v17 = vld [vmem:[%s364_s2] ss:$0 sm:$0xff] }
   0x9   :  { %v271_v23 = vld [vmem:[%s366_s4] ss:$0 sm:$0xff] }
   0xa   :  { %91 = vmatpush.bf16.msra.mxu0 %v259_v4 }
   0xb   :  { %174 = vmatpush.bf16.msra.mxu1 %v267_v5 }
   0xe   :  { %92 = vmatpush.bf16.msra.mxu0 %v258_v6 }
   0xf   :  { %175 = vmatpush.bf16.msra.mxu1 %v266_v7 }
  0x12   :  { %93 = vmatpush.bf16.msra.mxu0 %v257_v8 }
  0x13   :  { %176 = vmatpush.bf16.msra.mxu1 %v265_v9 }
  0x16   :  { %94 = vmatpush.bf16.msra.mxu0 %v256_v10 }
  0x17   :  { %177 = vmatpush.bf16.msra.mxu1 %v264_v11 }
  0x1a   :  { %95 = vmatpush.bf16.msra.mxu0 %v255_v12 }
  0x1b   :  { %178 = vmatpush.bf16.msra.mxu1 %v263_v15 }
  0x1e   :  { %96 = vmatpush.bf16.msra.mxu0 %v254_v13 }
  0x1f   :  { %179 = vmatpush.bf16.msra.mxu1 %v262_v16 }
  0x21   :  { %97 = vmatmul.bf16.vlgmr.msra.gmra.mxu0 %v20_v14 }
  0x9e   :  { %v98_v18 = vpop.f32.mrf.mxu0 }
  0x9f   :  { %v99_v19 = vadd.f32 %v270_v17, %v98_v18 }
  0xa1   :  { %v102_v20 = vmax.f32 %v99_v19, 0.0 }
  0xa3   :  { %v103_v21 = vpack.c.bf16 %v102_v20, %v102_v20 }
  0xa5   :  { %180 = vmatmul.bf16.vlgmr.msra.gmra.mxu1 %v103_v21 }
  0xa6   :  { %v100_v22 = vpop.f32.mrf.mxu0 }
 0x122   :  { %v181_v24 = vpop.f32.mrf.mxu1 }
 0x123   :  { %v182_v25 = vadd.f32 %v271_v23, %v181_v24 }
 0x125   :  { %185 = vst [vmem:[%s367_s5] sm:$0xff] %v182_v25 }
 0x12a   :  { %v183_v26 = vpop.f32.mrf.mxu1 }

</bundles_post_ra>
